<compile_context>
chip_gen: v6e
topology: v6e:2x2x1
jax: 0.10.0
libtpu: 0.0.40
codegen_flags: <defaults>
</compile_context>

<pallas_src>
import functools
import math

import jax
import jax.numpy as jnp
from jax.experimental import pallas as pl
from jax.experimental.pallas import tpu as pltpu


def _deepapp_kernel(x_ref, wih_ref, bih_ref, whh_ref, bhh_ref,
                    wo_ref, bo_ref, out_ref, gx_ref, *, T, B, H):
    """GRU recurrence + fused classifier heads.

    x_ref   : (T*B, Din)  time-major RNN input (rows t*B:(t+1)*B are step t)
    wih_ref : (Din, 3H)   fused input weights   (r|z|n)
    bih_ref : (1, 3H)
    whh_ref : (H, 3H)     fused hidden weights  (r|z|n)
    bhh_ref : (1, 3H)
    wo_ref  : (H, Npad)   fused classifier weights (user|loc|app, zero-padded)
    bo_ref  : (1, Npad)
    out_ref : (B, Npad)   lane-dense merged logits
    gx_ref  : (T*B, 3H)   VMEM scratch: hoisted input projection
    """
    # Hoisted input projection: one MXU matmul over all time steps (the x-side
    # gates do not depend on h) instead of 3 tiny matmuls per recurrent step.
    gx_ref[...] = jnp.dot(x_ref[...], wih_ref[...],
                          preferred_element_type=jnp.float32) + bih_ref[...]

    whh = whh_ref[...]                                      # (H, 3H)
    bhh = jnp.broadcast_to(bhh_ref[...], (B, 3 * H))        # hoisted broadcast

    h = jnp.zeros((B, H), jnp.float32)
    for t in range(T):                  # statically unrolled (T is small)
        ix = gx_ref[t * B:(t + 1) * B, :]                   # (B, 3H)
        gh = jnp.dot(h, whh, preferred_element_type=jnp.float32) + bhh
        # PyTorch GRU gate order: r, z, n ; n-gate hidden bias stays inside r*()
        r = jax.nn.sigmoid(ix[:, 0:H] + gh[:, 0:H])
        z = jax.nn.sigmoid(ix[:, H:2 * H] + gh[:, H:2 * H])
        n = jnp.tanh(ix[:, 2 * H:3 * H] + r * gh[:, 2 * H:3 * H])
        h = (1.0 - z) * n + z * h

    # Single fused classifier matmul, lane-dense (padded to 128) output.
    out_ref[...] = jnp.dot(h, wo_ref[...],
                           preferred_element_type=jnp.float32) + bo_ref[...]


def _build_rnn_input(params, times, locs, app_seq):
    """Embedding lookups + repeat + concat (plain JAX glue). Returns (T, B, 3*dim)."""
    time_vec = jnp.take(params["time_emb"], times[:, 0], axis=0)    # (B, dim)
    loc_vec = jnp.take(params["loc_emb"], locs[:, 0], axis=0)       # (B, dim)
    app_vec = jnp.take(params["app_emb"], app_seq, axis=0)          # (B, T, dim)
    B, T, dim = app_vec.shape
    time_rep = jnp.broadcast_to(time_vec[:, None, :], (B, T, dim))  # repeat(1, T, 1)
    loc_rep = jnp.broadcast_to(loc_vec[:, None, :], (B, T, dim))
    x = jnp.concatenate([time_rep, loc_rep, app_vec], axis=2)       # (B, T, 3*dim)
    return jnp.transpose(x, (1, 0, 2)).astype(jnp.float32)          # (T, B, 3*dim)


def deepapp_forward(params, times, locs, app_seq):
    x = _build_rnn_input(params, times, locs, app_seq)              # (T, B, Din)
    T, B, Din = x.shape
    H = params["whh"].shape[-1]
    n_users = params["wu"].shape[-1]
    n_locs = params["wl"].shape[-1]
    n_apps = params["wa"].shape[-1]

    x2d = x.reshape(T * B, Din)                                     # time-major rows

    # Fuse per-gate GRU weights (r|z|n) along the lane axis.
    wih = jnp.concatenate([params["wih"][g] for g in range(3)], axis=1)  # (Din, 3H)
    bih = jnp.concatenate([params["bih"][g] for g in range(3)], axis=1)  # (1, 3H)
    whh = jnp.concatenate([params["whh"][g] for g in range(3)], axis=1)  # (H, 3H)
    bhh = jnp.concatenate([params["bhh"][g] for g in range(3)], axis=1)  # (1, 3H)

    # Merge the three classifier heads and zero-pad to a lane-dense width.
    n_out = n_users + n_locs + n_apps
    n_pad = max(128, pl.cdiv(n_out, 128) * 128)
    wo = jnp.concatenate([params["wu"], params["wl"], params["wa"]], axis=1)  # (H, n_out)
    bo = jnp.concatenate([params["bu"], params["bl"], params["ba"]], axis=1)  # (1, n_out)
    wo = jnp.pad(wo, ((0, 0), (0, n_pad - n_out)))
    bo = jnp.pad(bo, ((0, 0), (0, n_pad - n_out)))

    kernel = functools.partial(_deepapp_kernel, T=T, B=B, H=H)
    logits = pl.pallas_call(
        kernel,
        out_shape=jax.ShapeDtypeStruct((B, n_pad), jnp.float32),
        scratch_shapes=[pltpu.VMEM((T * B, 3 * H), jnp.float32)],
    )(x2d, wih, bih, whh, bhh, wo, bo)

    return (logits[:, :n_users],
            logits[:, n_users:n_users + n_locs],
            logits[:, n_users + n_locs:n_out])


def reference_forward(params, times, locs, app_seq):
    """Pure-JAX reference (same math as torch.nn.GRU + Linear heads)."""
    x = _build_rnn_input(params, times, locs, app_seq)   # (T, B, Din)
    T, B, _ = x.shape
    H = params["whh"].shape[-1]
    hi = jax.lax.Precision.HIGHEST
    mm = lambda a, b: jnp.dot(a, b, precision=hi)
    h = jnp.zeros((B, H), jnp.float32)
    for t in range(T):
        xt = x[t]
        i_r = mm(xt, params["wih"][0]) + params["bih"][0]
        i_z = mm(xt, params["wih"][1]) + params["bih"][1]
        i_n = mm(xt, params["wih"][2]) + params["bih"][2]
        h_r = mm(h, params["whh"][0]) + params["bhh"][0]
        h_z = mm(h, params["whh"][1]) + params["bhh"][1]
        h_n = mm(h, params["whh"][2]) + params["bhh"][2]
        r = jax.nn.sigmoid(i_r + h_r)
        z = jax.nn.sigmoid(i_z + h_z)
        n = jnp.tanh(i_n + r * h_n)
        h = (1.0 - z) * n + z * h
    return (mm(h, params["wu"]) + params["bu"],
            mm(h, params["wl"]) + params["bl"],
            mm(h, params["wa"]) + params["ba"])


def init_params(key, n_users, n_times, n_locs, n_apps, hidden_dim, dim):
    ks = jax.random.split(key, 16)
    s = 1.0 / math.sqrt(hidden_dim)
    Din = 3 * dim
    u = lambda k, shp: jax.random.uniform(k, shp, jnp.float32, -s, s)
    return {
        "time_emb": jax.random.normal(ks[0], (n_times, dim), jnp.float32),
        "loc_emb": jax.random.normal(ks[1], (n_locs, dim), jnp.float32),
        "app_emb": jax.random.normal(ks[2], (n_apps, dim), jnp.float32),
        "wih": u(ks[3], (3, Din, hidden_dim)),       # GRU input weights (r, z, n)
        "whh": u(ks[4], (3, hidden_dim, hidden_dim)),
        "bih": u(ks[5], (3, 1, hidden_dim)),
        "bhh": u(ks[6], (3, 1, hidden_dim)),
        "wu": u(ks[7], (hidden_dim, n_users)), "bu": u(ks[8], (1, n_users)),
        "wl": u(ks[9], (hidden_dim, n_locs)), "bl": u(ks[10], (1, n_locs)),
        "wa": u(ks[11], (hidden_dim, n_apps)), "ba": u(ks[12], (1, n_apps)),
    }


if __name__ == "__main__":
    n_users, n_times, n_locs, n_apps = 10, 24, 20, 30
    hidden_dim, dim, seq_length, batch = 32, 16, 8, 2
    # model_type fixed to 'GRU' for this synthetic kernel.
    # TODO(synk): LSTM / vanilla-RNN variants would reuse the same structure
    # with different gate math; only GRU is implemented here.

    root = jax.random.PRNGKey(0)
    kp, kt, kl, ka = jax.random.split(root, 4)
    params = init_params(kp, n_users, n_times, n_locs, n_apps, hidden_dim, dim)
    times = jax.random.randint(kt, (batch, 1), 0, n_times)
    locs = jax.random.randint(kl, (batch, 1), 0, n_locs)
    app_seq = jax.random.randint(ka, (batch, seq_length), 0, n_apps)

    u_out, l_out, a_out = jax.block_until_ready(
        deepapp_forward(params, times, locs, app_seq))

    u_ref, l_ref, a_ref = reference_forward(params, times, locs, app_seq)
    assert jnp.allclose(u_out, u_ref, rtol=1e-2, atol=1e-2)
    assert jnp.allclose(l_out, l_ref, rtol=1e-2, atol=1e-2)
    assert jnp.allclose(a_out, a_ref, rtol=1e-2, atol=1e-2)

    print("KERNEL_OK")
</pallas_src>

<mosaic_0001>
module attributes {stable_mosaic.version = 11 : i64} {
  func.func @_deepapp_kernel(%arg0: memref<16x48xf32, #tpu.memory_space<vmem>>, %arg1: memref<48x96xf32, #tpu.memory_space<vmem>>, %arg2: memref<1x96xf32, #tpu.memory_space<vmem>>, %arg3: memref<32x96xf32, #tpu.memory_space<vmem>>, %arg4: memref<1x96xf32, #tpu.memory_space<vmem>>, %arg5: memref<32x128xf32, #tpu.memory_space<vmem>>, %arg6: memref<1x128xf32, #tpu.memory_space<vmem>>, %arg7: memref<2x128xf32, #tpu.memory_space<vmem>>, %arg8: memref<16x96xf32, #tpu.memory_space<vmem>>) attributes {dimension_semantics = [], scalar_prefetch = 0 : i64, scratch_operands = 1 : i64, tpu.core_type = #tpu.core_type<tc>} {
    %c0 = arith.constant 0 : index
    %c0_0 = arith.constant 0 : index
    %0 = vector.load %arg0[%c0, %c0_0] : memref<16x48xf32, #tpu.memory_space<vmem>>, vector<16x48xf32>
    %c0_1 = arith.constant 0 : index
    %c0_2 = arith.constant 0 : index
    %1 = vector.load %arg1[%c0_1, %c0_2] : memref<48x96xf32, #tpu.memory_space<vmem>>, vector<48x96xf32>
    %cst = arith.constant dense<0.000000e+00> : vector<16x96xf32>
    %2 = tpu.matmul %0, %1, %cst {dimension_numbers = #tpu.dot_dimension_numbers<[1], [0], [0], [1], [0, 0, 1, 1], [], []>} : vector<16x48xf32>, vector<48x96xf32>, vector<16x96xf32> -> vector<16x96xf32>
    %c0_3 = arith.constant 0 : index
    %c0_4 = arith.constant 0 : index
    %3 = vector.load %arg2[%c0_3, %c0_4] : memref<1x96xf32, #tpu.memory_space<vmem>>, vector<1x96xf32>
    %4 = vector.broadcast %3 : vector<1x96xf32> to vector<16x96xf32>
    %5 = arith.addf %2, %4 : vector<16x96xf32>
    %c0_5 = arith.constant 0 : index
    %c0_6 = arith.constant 0 : index
    %6 = vector.load %arg8[%c0_5, %c0_6] : memref<16x96xf32, #tpu.memory_space<vmem>>, vector<16x96xf32>
    tpu.vector_store %arg8[%c0_5, %c0_6], %5 {strides = array<i32>} : memref<16x96xf32, #tpu.memory_space<vmem>>, vector<16x96xf32>,
    %c0_7 = arith.constant 0 : index
    %c0_8 = arith.constant 0 : index
    %7 = vector.load %arg3[%c0_7, %c0_8] : memref<32x96xf32, #tpu.memory_space<vmem>>, vector<32x96xf32>
    %c0_9 = arith.constant 0 : index
    %c0_10 = arith.constant 0 : index
    %8 = vector.load %arg4[%c0_9, %c0_10] : memref<1x96xf32, #tpu.memory_space<vmem>>, vector<1x96xf32>
    %9 = vector.shape_cast %8 : vector<1x96xf32> to vector<1x96xf32>
    %10 = vector.broadcast %9 : vector<1x96xf32> to vector<2x96xf32>
    %cst_11 = arith.constant 0.000000e+00 : f32
    %11 = vector.broadcast %cst_11 : f32 to vector<2x32xf32>
    %c0_12 = arith.constant 0 : index
    %c0_13 = arith.constant 0 : index
    %12 = vector.load %arg8[%c0_12, %c0_13] : memref<16x96xf32, #tpu.memory_space<vmem>>, vector<2x96xf32>
    %cst_14 = arith.constant dense<0.000000e+00> : vector<2x96xf32>
    %13 = tpu.matmul %11, %7, %cst_14 {dimension_numbers = #tpu.dot_dimension_numbers<[1], [0], [0], [1], [0, 0, 1, 1], [], []>} : vector<2x32xf32>, vector<32x96xf32>, vector<2x96xf32> -> vector<2x96xf32>
    %14 = arith.addf %13, %10 : vector<2x96xf32>
    %15 = vector.extract_strided_slice %12 {offsets = [0, 0], sizes = [2, 32], strides = [1, 1]} : vector<2x96xf32> to vector<2x32xf32>
    %16 = vector.extract_strided_slice %14 {offsets = [0, 0], sizes = [2, 32], strides = [1, 1]} : vector<2x96xf32> to vector<2x32xf32>
    %17 = arith.addf %15, %16 : vector<2x32xf32>
    %18 = arith.negf %17 : vector<2x32xf32>
    %19 = math.exp %18 : vector<2x32xf32>
    %cst_15 = arith.constant 1.000000e+00 : f32
    %20 = vector.broadcast %cst_15 : f32 to vector<2x32xf32>
    %21 = arith.addf %20, %19 : vector<2x32xf32>
    %22 = arith.divf %20, %21 : vector<2x32xf32>
    %23 = vector.extract_strided_slice %12 {offsets = [0, 32], sizes = [2, 32], strides = [1, 1]} : vector<2x96xf32> to vector<2x32xf32>
    %24 = vector.extract_strided_slice %14 {offsets = [0, 32], sizes = [2, 32], strides = [1, 1]} : vector<2x96xf32> to vector<2x32xf32>
    %25 = arith.addf %23, %24 : vector<2x32xf32>
    %26 = arith.negf %25 : vector<2x32xf32>
    %27 = math.exp %26 : vector<2x32xf32>
    %cst_16 = arith.constant 1.000000e+00 : f32
    %28 = vector.broadcast %cst_16 : f32 to vector<2x32xf32>
    %29 = arith.addf %28, %27 : vector<2x32xf32>
    %30 = arith.divf %28, %29 : vector<2x32xf32>
    %31 = vector.extract_strided_slice %12 {offsets = [0, 64], sizes = [2, 32], strides = [1, 1]} : vector<2x96xf32> to vector<2x32xf32>
    %32 = vector.extract_strided_slice %14 {offsets = [0, 64], sizes = [2, 32], strides = [1, 1]} : vector<2x96xf32> to vector<2x32xf32>
    %33 = arith.mulf %22, %32 : vector<2x32xf32>
    %34 = arith.addf %31, %33 : vector<2x32xf32>
    %35 = math.tanh %34 : vector<2x32xf32>
    %cst_17 = arith.constant 1.000000e+00 : f32
    %36 = vector.broadcast %cst_17 : f32 to vector<2x32xf32>
    %37 = arith.subf %36, %30 : vector<2x32xf32>
    %38 = arith.mulf %37, %35 : vector<2x32xf32>
    %39 = arith.mulf %30, %11 : vector<2x32xf32>
    %40 = arith.addf %38, %39 : vector<2x32xf32>
    %c2 = arith.constant 2 : index
    %c0_18 = arith.constant 0 : index
    %41 = vector.load %arg8[%c2, %c0_18] : memref<16x96xf32, #tpu.memory_space<vmem>>, vector<2x96xf32>
    %cst_19 = arith.constant dense<0.000000e+00> : vector<2x96xf32>
    %42 = tpu.matmul %40, %7, %cst_19 {dimension_numbers = #tpu.dot_dimension_numbers<[1], [0], [0], [1], [0, 0, 1, 1], [], []>} : vector<2x32xf32>, vector<32x96xf32>, vector<2x96xf32> -> vector<2x96xf32>
    %43 = arith.addf %42, %10 : vector<2x96xf32>
    %44 = vector.extract_strided_slice %41 {offsets = [0, 0], sizes = [2, 32], strides = [1, 1]} : vector<2x96xf32> to vector<2x32xf32>
    %45 = vector.extract_strided_slice %43 {offsets = [0, 0], sizes = [2, 32], strides = [1, 1]} : vector<2x96xf32> to vector<2x32xf32>
    %46 = arith.addf %44, %45 : vector<2x32xf32>
    %47 = arith.negf %46 : vector<2x32xf32>
    %48 = math.exp %47 : vector<2x32xf32>
    %cst_20 = arith.constant 1.000000e+00 : f32
    %49 = vector.broadcast %cst_20 : f32 to vector<2x32xf32>
    %50 = arith.addf %49, %48 : vector<2x32xf32>
    %51 = arith.divf %49, %50 : vector<2x32xf32>
    %52 = vector.extract_strided_slice %41 {offsets = [0, 32], sizes = [2, 32], strides = [1, 1]} : vector<2x96xf32> to vector<2x32xf32>
    %53 = vector.extract_strided_slice %43 {offsets = [0, 32], sizes = [2, 32], strides = [1, 1]} : vector<2x96xf32> to vector<2x32xf32>
    %54 = arith.addf %52, %53 : vector<2x32xf32>
    %55 = arith.negf %54 : vector<2x32xf32>
    %56 = math.exp %55 : vector<2x32xf32>
    %cst_21 = arith.constant 1.000000e+00 : f32
    %57 = vector.broadcast %cst_21 : f32 to vector<2x32xf32>
    %58 = arith.addf %57, %56 : vector<2x32xf32>
    %59 = arith.divf %57, %58 : vector<2x32xf32>
    %60 = vector.extract_strided_slice %41 {offsets = [0, 64], sizes = [2, 32], strides = [1, 1]} : vector<2x96xf32> to vector<2x32xf32>
    %61 = vector.extract_strided_slice %43 {offsets = [0, 64], sizes = [2, 32], strides = [1, 1]} : vector<2x96xf32> to vector<2x32xf32>
    %62 = arith.mulf %51, %61 : vector<2x32xf32>
    %63 = arith.addf %60, %62 : vector<2x32xf32>
    %64 = math.tanh %63 : vector<2x32xf32>
    %cst_22 = arith.constant 1.000000e+00 : f32
    %65 = vector.broadcast %cst_22 : f32 to vector<2x32xf32>
    %66 = arith.subf %65, %59 : vector<2x32xf32>
    %67 = arith.mulf %66, %64 : vector<2x32xf32>
    %68 = arith.mulf %59, %40 : vector<2x32xf32>
    %69 = arith.addf %67, %68 : vector<2x32xf32>
    %c4 = arith.constant 4 : index
    %c0_23 = arith.constant 0 : index
    %70 = vector.load %arg8[%c4, %c0_23] : memref<16x96xf32, #tpu.memory_space<vmem>>, vector<2x96xf32>
    %cst_24 = arith.constant dense<0.000000e+00> : vector<2x96xf32>
    %71 = tpu.matmul %69, %7, %cst_24 {dimension_numbers = #tpu.dot_dimension_numbers<[1], [0], [0], [1], [0, 0, 1, 1], [], []>} : vector<2x32xf32>, vector<32x96xf32>, vector<2x96xf32> -> vector<2x96xf32>
    %72 = arith.addf %71, %10 : vector<2x96xf32>
    %73 = vector.extract_strided_slice %70 {offsets = [0, 0], sizes = [2, 32], strides = [1, 1]} : vector<2x96xf32> to vector<2x32xf32>
    %74 = vector.extract_strided_slice %72 {offsets = [0, 0], sizes = [2, 32], strides = [1, 1]} : vector<2x96xf32> to vector<2x32xf32>
    %75 = arith.addf %73, %74 : vector<2x32xf32>
    %76 = arith.negf %75 : vector<2x32xf32>
    %77 = math.exp %76 : vector<2x32xf32>
    %cst_25 = arith.constant 1.000000e+00 : f32
    %78 = vector.broadcast %cst_25 : f32 to vector<2x32xf32>
    %79 = arith.addf %78, %77 : vector<2x32xf32>
    %80 = arith.divf %78, %79 : vector<2x32xf32>
    %81 = vector.extract_strided_slice %70 {offsets = [0, 32], sizes = [2, 32], strides = [1, 1]} : vector<2x96xf32> to vector<2x32xf32>
    %82 = vector.extract_strided_slice %72 {offsets = [0, 32], sizes = [2, 32], strides = [1, 1]} : vector<2x96xf32> to vector<2x32xf32>
    %83 = arith.addf %81, %82 : vector<2x32xf32>
    %84 = arith.negf %83 : vector<2x32xf32>
    %85 = math.exp %84 : vector<2x32xf32>
    %cst_26 = arith.constant 1.000000e+00 : f32
    %86 = vector.broadcast %cst_26 : f32 to vector<2x32xf32>
    %87 = arith.addf %86, %85 : vector<2x32xf32>
    %88 = arith.divf %86, %87 : vector<2x32xf32>
    %89 = vector.extract_strided_slice %70 {offsets = [0, 64], sizes = [2, 32], strides = [1, 1]} : vector<2x96xf32> to vector<2x32xf32>
    %90 = vector.extract_strided_slice %72 {offsets = [0, 64], sizes = [2, 32], strides = [1, 1]} : vector<2x96xf32> to vector<2x32xf32>
    %91 = arith.mulf %80, %90 : vector<2x32xf32>
    %92 = arith.addf %89, %91 : vector<2x32xf32>
    %93 = math.tanh %92 : vector<2x32xf32>
    %cst_27 = arith.constant 1.000000e+00 : f32
    %94 = vector.broadcast %cst_27 : f32 to vector<2x32xf32>
    %95 = arith.subf %94, %88 : vector<2x32xf32>
    %96 = arith.mulf %95, %93 : vector<2x32xf32>
    %97 = arith.mulf %88, %69 : vector<2x32xf32>
    %98 = arith.addf %96, %97 : vector<2x32xf32>
    %c6 = arith.constant 6 : index
    %c0_28 = arith.constant 0 : index
    %99 = vector.load %arg8[%c6, %c0_28] : memref<16x96xf32, #tpu.memory_space<vmem>>, vector<2x96xf32>
    %cst_29 = arith.constant dense<0.000000e+00> : vector<2x96xf32>
    %100 = tpu.matmul %98, %7, %cst_29 {dimension_numbers = #tpu.dot_dimension_numbers<[1], [0], [0], [1], [0, 0, 1, 1], [], []>} : vector<2x32xf32>, vector<32x96xf32>, vector<2x96xf32> -> vector<2x96xf32>
    %101 = arith.addf %100, %10 : vector<2x96xf32>
    %102 = vector.extract_strided_slice %99 {offsets = [0, 0], sizes = [2, 32], strides = [1, 1]} : vector<2x96xf32> to vector<2x32xf32>
    %103 = vector.extract_strided_slice %101 {offsets = [0, 0], sizes = [2, 32], strides = [1, 1]} : vector<2x96xf32> to vector<2x32xf32>
    %104 = arith.addf %102, %103 : vector<2x32xf32>
    %105 = arith.negf %104 : vector<2x32xf32>
    %106 = math.exp %105 : vector<2x32xf32>
    %cst_30 = arith.constant 1.000000e+00 : f32
    %107 = vector.broadcast %cst_30 : f32 to vector<2x32xf32>
    %108 = arith.addf %107, %106 : vector<2x32xf32>
    %109 = arith.divf %107, %108 : vector<2x32xf32>
    %110 = vector.extract_strided_slice %99 {offsets = [0, 32], sizes = [2, 32], strides = [1, 1]} : vector<2x96xf32> to vector<2x32xf32>
    %111 = vector.extract_strided_slice %101 {offsets = [0, 32], sizes = [2, 32], strides = [1, 1]} : vector<2x96xf32> to vector<2x32xf32>
    %112 = arith.addf %110, %111 : vector<2x32xf32>
    %113 = arith.negf %112 : vector<2x32xf32>
    %114 = math.exp %113 : vector<2x32xf32>
    %cst_31 = arith.constant 1.000000e+00 : f32
    %115 = vector.broadcast %cst_31 : f32 to vector<2x32xf32>
    %116 = arith.addf %115, %114 : vector<2x32xf32>
    %117 = arith.divf %115, %116 : vector<2x32xf32>
    %118 = vector.extract_strided_slice %99 {offsets = [0, 64], sizes = [2, 32], strides = [1, 1]} : vector<2x96xf32> to vector<2x32xf32>
    %119 = vector.extract_strided_slice %101 {offsets = [0, 64], sizes = [2, 32], strides = [1, 1]} : vector<2x96xf32> to vector<2x32xf32>
    %120 = arith.mulf %109, %119 : vector<2x32xf32>
    %121 = arith.addf %118, %120 : vector<2x32xf32>
    %122 = math.tanh %121 : vector<2x32xf32>
    %cst_32 = arith.constant 1.000000e+00 : f32
    %123 = vector.broadcast %cst_32 : f32 to vector<2x32xf32>
    %124 = arith.subf %123, %117 : vector<2x32xf32>
    %125 = arith.mulf %124, %122 : vector<2x32xf32>
    %126 = arith.mulf %117, %98 : vector<2x32xf32>
    %127 = arith.addf %125, %126 : vector<2x32xf32>
    %c8 = arith.constant 8 : index
    %c0_33 = arith.constant 0 : index
    %128 = vector.load %arg8[%c8, %c0_33] : memref<16x96xf32, #tpu.memory_space<vmem>>, vector<2x96xf32>
    %cst_34 = arith.constant dense<0.000000e+00> : vector<2x96xf32>
    %129 = tpu.matmul %127, %7, %cst_34 {dimension_numbers = #tpu.dot_dimension_numbers<[1], [0], [0], [1], [0, 0, 1, 1], [], []>} : vector<2x32xf32>, vector<32x96xf32>, vector<2x96xf32> -> vector<2x96xf32>
    %130 = arith.addf %129, %10 : vector<2x96xf32>
    %131 = vector.extract_strided_slice %128 {offsets = [0, 0], sizes = [2, 32], strides = [1, 1]} : vector<2x96xf32> to vector<2x32xf32>
    %132 = vector.extract_strided_slice %130 {offsets = [0, 0], sizes = [2, 32], strides = [1, 1]} : vector<2x96xf32> to vector<2x32xf32>
    %133 = arith.addf %131, %132 : vector<2x32xf32>
    %134 = arith.negf %133 : vector<2x32xf32>
    %135 = math.exp %134 : vector<2x32xf32>
    %cst_35 = arith.constant 1.000000e+00 : f32
    %136 = vector.broadcast %cst_35 : f32 to vector<2x32xf32>
    %137 = arith.addf %136, %135 : vector<2x32xf32>
    %138 = arith.divf %136, %137 : vector<2x32xf32>
    %139 = vector.extract_strided_slice %128 {offsets = [0, 32], sizes = [2, 32], strides = [1, 1]} : vector<2x96xf32> to vector<2x32xf32>
    %140 = vector.extract_strided_slice %130 {offsets = [0, 32], sizes = [2, 32], strides = [1, 1]} : vector<2x96xf32> to vector<2x32xf32>
    %141 = arith.addf %139, %140 : vector<2x32xf32>
    %142 = arith.negf %141 : vector<2x32xf32>
    %143 = math.exp %142 : vector<2x32xf32>
    %cst_36 = arith.constant 1.000000e+00 : f32
    %144 = vector.broadcast %cst_36 : f32 to vector<2x32xf32>
    %145 = arith.addf %144, %143 : vector<2x32xf32>
    %146 = arith.divf %144, %145 : vector<2x32xf32>
    %147 = vector.extract_strided_slice %128 {offsets = [0, 64], sizes = [2, 32], strides = [1, 1]} : vector<2x96xf32> to vector<2x32xf32>
    %148 = vector.extract_strided_slice %130 {offsets = [0, 64], sizes = [2, 32], strides = [1, 1]} : vector<2x96xf32> to vector<2x32xf32>
    %149 = arith.mulf %138, %148 : vector<2x32xf32>
    %150 = arith.addf %147, %149 : vector<2x32xf32>
    %151 = math.tanh %150 : vector<2x32xf32>
    %cst_37 = arith.constant 1.000000e+00 : f32
    %152 = vector.broadcast %cst_37 : f32 to vector<2x32xf32>
    %153 = arith.subf %152, %146 : vector<2x32xf32>
    %154 = arith.mulf %153, %151 : vector<2x32xf32>
    %155 = arith.mulf %146, %127 : vector<2x32xf32>
    %156 = arith.addf %154, %155 : vector<2x32xf32>
    %c10 = arith.constant 10 : index
    %c0_38 = arith.constant 0 : index
    %157 = vector.load %arg8[%c10, %c0_38] : memref<16x96xf32, #tpu.memory_space<vmem>>, vector<2x96xf32>
    %cst_39 = arith.constant dense<0.000000e+00> : vector<2x96xf32>
    %158 = tpu.matmul %156, %7, %cst_39 {dimension_numbers = #tpu.dot_dimension_numbers<[1], [0], [0], [1], [0, 0, 1, 1], [], []>} : vector<2x32xf32>, vector<32x96xf32>, vector<2x96xf32> -> vector<2x96xf32>
    %159 = arith.addf %158, %10 : vector<2x96xf32>
    %160 = vector.extract_strided_slice %157 {offsets = [0, 0], sizes = [2, 32], strides = [1, 1]} : vector<2x96xf32> to vector<2x32xf32>
    %161 = vector.extract_strided_slice %159 {offsets = [0, 0], sizes = [2, 32], strides = [1, 1]} : vector<2x96xf32> to vector<2x32xf32>
    %162 = arith.addf %160, %161 : vector<2x32xf32>
    %163 = arith.negf %162 : vector<2x32xf32>
    %164 = math.exp %163 : vector<2x32xf32>
    %cst_40 = arith.constant 1.000000e+00 : f32
    %165 = vector.broadcast %cst_40 : f32 to vector<2x32xf32>
    %166 = arith.addf %165, %164 : vector<2x32xf32>
    %167 = arith.divf %165, %166 : vector<2x32xf32>
    %168 = vector.extract_strided_slice %157 {offsets = [0, 32], sizes = [2, 32], strides = [1, 1]} : vector<2x96xf32> to vector<2x32xf32>
    %169 = vector.extract_strided_slice %159 {offsets = [0, 32], sizes = [2, 32], strides = [1, 1]} : vector<2x96xf32> to vector<2x32xf32>
    %170 = arith.addf %168, %169 : vector<2x32xf32>
    %171 = arith.negf %170 : vector<2x32xf32>
    %172 = math.exp %171 : vector<2x32xf32>
    %cst_41 = arith.constant 1.000000e+00 : f32
    %173 = vector.broadcast %cst_41 : f32 to vector<2x32xf32>
    %174 = arith.addf %173, %172 : vector<2x32xf32>
    %175 = arith.divf %173, %174 : vector<2x32xf32>
    %176 = vector.extract_strided_slice %157 {offsets = [0, 64], sizes = [2, 32], strides = [1, 1]} : vector<2x96xf32> to vector<2x32xf32>
    %177 = vector.extract_strided_slice %159 {offsets = [0, 64], sizes = [2, 32], strides = [1, 1]} : vector<2x96xf32> to vector<2x32xf32>
    %178 = arith.mulf %167, %177 : vector<2x32xf32>
    %179 = arith.addf %176, %178 : vector<2x32xf32>
    %180 = math.tanh %179 : vector<2x32xf32>
    %cst_42 = arith.constant 1.000000e+00 : f32
    %181 = vector.broadcast %cst_42 : f32 to vector<2x32xf32>
    %182 = arith.subf %181, %175 : vector<2x32xf32>
    %183 = arith.mulf %182, %180 : vector<2x32xf32>
    %184 = arith.mulf %175, %156 : vector<2x32xf32>
    %185 = arith.addf %183, %184 : vector<2x32xf32>
    %c12 = arith.constant 12 : index
    %c0_43 = arith.constant 0 : index
    %186 = vector.load %arg8[%c12, %c0_43] : memref<16x96xf32, #tpu.memory_space<vmem>>, vector<2x96xf32>
    %cst_44 = arith.constant dense<0.000000e+00> : vector<2x96xf32>
    %187 = tpu.matmul %185, %7, %cst_44 {dimension_numbers = #tpu.dot_dimension_numbers<[1], [0], [0], [1], [0, 0, 1, 1], [], []>} : vector<2x32xf32>, vector<32x96xf32>, vector<2x96xf32> -> vector<2x96xf32>
    %188 = arith.addf %187, %10 : vector<2x96xf32>
    %189 = vector.extract_strided_slice %186 {offsets = [0, 0], sizes = [2, 32], strides = [1, 1]} : vector<2x96xf32> to vector<2x32xf32>
    %190 = vector.extract_strided_slice %188 {offsets = [0, 0], sizes = [2, 32], strides = [1, 1]} : vector<2x96xf32> to vector<2x32xf32>
    %191 = arith.addf %189, %190 : vector<2x32xf32>
    %192 = arith.negf %191 : vector<2x32xf32>
    %193 = math.exp %192 : vector<2x32xf32>
    %cst_45 = arith.constant 1.000000e+00 : f32
    %194 = vector.broadcast %cst_45 : f32 to vector<2x32xf32>
    %195 = arith.addf %194, %193 : vector<2x32xf32>
    %196 = arith.divf %194, %195 : vector<2x32xf32>
    %197 = vector.extract_strided_slice %186 {offsets = [0, 32], sizes = [2, 32], strides = [1, 1]} : vector<2x96xf32> to vector<2x32xf32>
    %198 = vector.extract_strided_slice %188 {offsets = [0, 32], sizes = [2, 32], strides = [1, 1]} : vector<2x96xf32> to vector<2x32xf32>
    %199 = arith.addf %197, %198 : vector<2x32xf32>
    %200 = arith.negf %199 : vector<2x32xf32>
    %201 = math.exp %200 : vector<2x32xf32>
    %cst_46 = arith.constant 1.000000e+00 : f32
    %202 = vector.broadcast %cst_46 : f32 to vector<2x32xf32>
    %203 = arith.addf %202, %201 : vector<2x32xf32>
    %204 = arith.divf %202, %203 : vector<2x32xf32>
    %205 = vector.extract_strided_slice %186 {offsets = [0, 64], sizes = [2, 32], strides = [1, 1]} : vector<2x96xf32> to vector<2x32xf32>
    %206 = vector.extract_strided_slice %188 {offsets = [0, 64], sizes = [2, 32], strides = [1, 1]} : vector<2x96xf32> to vector<2x32xf32>
    %207 = arith.mulf %196, %206 : vector<2x32xf32>
    %208 = arith.addf %205, %207 : vector<2x32xf32>
    %209 = math.tanh %208 : vector<2x32xf32>
    %cst_47 = arith.constant 1.000000e+00 : f32
    %210 = vector.broadcast %cst_47 : f32 to vector<2x32xf32>
    %211 = arith.subf %210, %204 : vector<2x32xf32>
    %212 = arith.mulf %211, %209 : vector<2x32xf32>
    %213 = arith.mulf %204, %185 : vector<2x32xf32>
    %214 = arith.addf %212, %213 : vector<2x32xf32>
    %c14 = arith.constant 14 : index
    %c0_48 = arith.constant 0 : index
    %215 = vector.load %arg8[%c14, %c0_48] : memref<16x96xf32, #tpu.memory_space<vmem>>, vector<2x96xf32>
    %cst_49 = arith.constant dense<0.000000e+00> : vector<2x96xf32>
    %216 = tpu.matmul %214, %7, %cst_49 {dimension_numbers = #tpu.dot_dimension_numbers<[1], [0], [0], [1], [0, 0, 1, 1], [], []>} : vector<2x32xf32>, vector<32x96xf32>, vector<2x96xf32> -> vector<2x96xf32>
    %217 = arith.addf %216, %10 : vector<2x96xf32>
    %218 = vector.extract_strided_slice %215 {offsets = [0, 0], sizes = [2, 32], strides = [1, 1]} : vector<2x96xf32> to vector<2x32xf32>
    %219 = vector.extract_strided_slice %217 {offsets = [0, 0], sizes = [2, 32], strides = [1, 1]} : vector<2x96xf32> to vector<2x32xf32>
    %220 = arith.addf %218, %219 : vector<2x32xf32>
    %221 = arith.negf %220 : vector<2x32xf32>
    %222 = math.exp %221 : vector<2x32xf32>
    %cst_50 = arith.constant 1.000000e+00 : f32
    %223 = vector.broadcast %cst_50 : f32 to vector<2x32xf32>
    %224 = arith.addf %223, %222 : vector<2x32xf32>
    %225 = arith.divf %223, %224 : vector<2x32xf32>
    %226 = vector.extract_strided_slice %215 {offsets = [0, 32], sizes = [2, 32], strides = [1, 1]} : vector<2x96xf32> to vector<2x32xf32>
    %227 = vector.extract_strided_slice %217 {offsets = [0, 32], sizes = [2, 32], strides = [1, 1]} : vector<2x96xf32> to vector<2x32xf32>
    %228 = arith.addf %226, %227 : vector<2x32xf32>
    %229 = arith.negf %228 : vector<2x32xf32>
    %230 = math.exp %229 : vector<2x32xf32>
    %cst_51 = arith.constant 1.000000e+00 : f32
    %231 = vector.broadcast %cst_51 : f32 to vector<2x32xf32>
    %232 = arith.addf %231, %230 : vector<2x32xf32>
    %233 = arith.divf %231, %232 : vector<2x32xf32>
    %234 = vector.extract_strided_slice %215 {offsets = [0, 64], sizes = [2, 32], strides = [1, 1]} : vector<2x96xf32> to vector<2x32xf32>
    %235 = vector.extract_strided_slice %217 {offsets = [0, 64], sizes = [2, 32], strides = [1, 1]} : vector<2x96xf32> to vector<2x32xf32>
    %236 = arith.mulf %225, %235 : vector<2x32xf32>
    %237 = arith.addf %234, %236 : vector<2x32xf32>
    %238 = math.tanh %237 : vector<2x32xf32>
    %cst_52 = arith.constant 1.000000e+00 : f32
    %239 = vector.broadcast %cst_52 : f32 to vector<2x32xf32>
    %240 = arith.subf %239, %233 : vector<2x32xf32>
    %241 = arith.mulf %240, %238 : vector<2x32xf32>
    %242 = arith.mulf %233, %214 : vector<2x32xf32>
    %243 = arith.addf %241, %242 : vector<2x32xf32>
    %c0_53 = arith.constant 0 : index
    %c0_54 = arith.constant 0 : index
    %244 = vector.load %arg5[%c0_53, %c0_54] : memref<32x128xf32, #tpu.memory_space<vmem>>, vector<32x128xf32>
    %cst_55 = arith.constant dense<0.000000e+00> : vector<2x128xf32>
    %245 = tpu.matmul %243, %244, %cst_55 {dimension_numbers = #tpu.dot_dimension_numbers<[1], [0], [0], [1], [0, 0, 1, 1], [], []>} : vector<2x32xf32>, vector<32x128xf32>, vector<2x128xf32> -> vector<2x128xf32>
    %c0_56 = arith.constant 0 : index
    %c0_57 = arith.constant 0 : index
    %246 = vector.load %arg6[%c0_56, %c0_57] : memref<1x128xf32, #tpu.memory_space<vmem>>, vector<1x128xf32>
    %247 = vector.broadcast %246 : vector<1x128xf32> to vector<2x128xf32>
    %248 = arith.addf %245, %247 : vector<2x128xf32>
    %c0_58 = arith.constant 0 : index
    %c0_59 = arith.constant 0 : index
    %249 = vector.load %arg7[%c0_58, %c0_59] : memref<2x128xf32, #tpu.memory_space<vmem>>, vector<2x128xf32>
    tpu.vector_store %arg7[%c0_58, %c0_59], %248 {strides = array<i32>} : memref<2x128xf32, #tpu.memory_space<vmem>>, vector<2x128xf32>,
    return
  }
}

</mosaic_0001>

<bundles_post_ra>
// kernel: tpu_custom_call.1
= control target key start
LH: loop header
LB: loop body
LE: loop exit
PB: predicated region body
PF: predicated region fallthrough
CT: control target
= control target key end

     0   :  { %12 = vsyncpa [#allocation4], 0  ;;  %s1699_s0 = inlined_call_operand.hbm [shape: f32[16,48], index: 0, kind: input, shape index: {}]   ;;  %s1700_s1 = inlined_call_operand.hbm [shape: f32[48,96], index: 1, kind: input, shape index: {}]   ;;  %s1701_s2 = inlined_call_operand.vmem [shape: f32[1,96], index: 2, kind: input, shape index: {}]   ;;  %s1702_s3 = inlined_call_operand.hbm [shape: f32[32,96], index: 3, kind: input, shape index: {}]   ;;  %s1703_s4 = inlined_call_operand.vmem [shape: f32[1,96], index: 4, kind: input, shape index: {}]   ;;  %s1704_s5 = inlined_call_operand.hbm [shape: f32[32,128], index: 5, kind: input, shape index: {}]   ;;  %s1705_s6 = inlined_call_operand.vmem [shape: f32[1,128], index: 6, kind: input, shape index: {}]   ;;  %s1706_s7 = inlined_call_operand.hbm [shape: f32[2,128], index: 7, kind: output, shape index: {}]  }
   0x1   :  { %13 = vsyncpa [#allocation7], 0 }
   0x2   :  { %14 = vsyncpa [#allocation10], 0 }
   0x3   :  { %15 = vsyncpa [#allocation5], 0  ;;  %s1467_s24 = smov [#allocation6]   ;;  %s1468_s26 = smov [#allocation3]  }
   0x4   :  { %s33_s25 = sshll.u32 %s1467_s24, 4  ;;  %s21_s27 = sshll.u32 %s1468_s26, 4  ;;  %s34_s25 = int_to_ptr.vmem [resolvable:$true] %s33_s25  ;;  %s22_s27 = int_to_ptr.vmem [resolvable:$true] %s21_s27 }
   0x5   :  { %s1367_s28 = scalar_lea.vmem %s34_s25, 768  ;;  %p1372_p1 = scmp.lt.s32.totalorder %s34_s25, %s34_s25 }
   0x6   :  { %p1368_p0 = scmp.ne.s32.totalorder %s34_s25, %s1367_s28  ;;  %p1373_p2 = scmp.lt.s32.totalorder %s1367_s28, %s1367_s28 }
   0x8   :  { %p1374_p3 = por %p1373_p2, %p1372_p1 }
   0xa   :  { %p1375_p4 = pnand %p1374_p3, %p1368_p0 }
   0xc   :  { %1378 = shalt.err (!%p1375_p4)
}
   0xd   :  { %s1469_s29 = smov 128   ;;  %s1470_s30 = smov 8  }
   0xe   :  { %39 = dma.hbm_to_vmem [thread:$0]  %s1700_s1, 768, %s34_s25, [#allocation7], %s1469_s29, %s1469_s29, %s1470_s30  }
   0xf   :  { %s1387_s10 = scalar_lea.vmem %s22_s27, 256  ;;  %p1392_p6 = scmp.lt.s32.totalorder %s22_s27, %s22_s27 }
  0x10   :  { %p1388_p5 = scmp.ne.s32.totalorder %s22_s27, %s1387_s10  ;;  %p1393_p7 = scmp.lt.s32.totalorder %s1387_s10, %s1387_s10 }
  0x12   :  { %p1394_p8 = por %p1393_p7, %p1392_p6 }
  0x14   :  { %p1395_p9 = pnand %p1394_p8, %p1388_p5 }
  0x16   :  { %1398 = shalt.err (!%p1395_p9)
}
  0x17   :  { %27 = dma.hbm_to_vmem [thread:$0]  %s1699_s0, 256, %s22_s27, [#allocation4], %s1469_s29, %s1469_s29, %s1470_s30  }
  0x18   :  { %s1471_s13 = smov [#allocation8]   ;;  %s1472_s15 = smov [#allocation9]  }
  0x19   :  { %s47_s14 = sshll.u32 %s1471_s13, 4  ;;  %s61_s16 = sshll.u32 %s1472_s15, 4  ;;  %s48_s14 = int_to_ptr.vmem [resolvable:$true] %s47_s14  ;;  %s62_s16 = int_to_ptr.vmem [resolvable:$true] %s61_s16 }
  0x1a   :  { %s1407_s1 = scalar_lea.vmem %s48_s14, 512  ;;  %p1412_p11 = scmp.lt.s32.totalorder %s48_s14, %s48_s14 }
  0x1b   :  { %p1408_p10 = scmp.ne.s32.totalorder %s48_s14, %s1407_s1  ;;  %p1413_p12 = scmp.lt.s32.totalorder %s1407_s1, %s1407_s1 }
  0x1d   :  { %p1414_p13 = por %p1413_p12, %p1412_p11 }
  0x1f   :  { %p1415_p0 = pnand %p1414_p13, %p1408_p10 }
  0x21   :  { %1418 = shalt.err (!%p1415_p0)
}
  0x22   :  { %53 = dma.hbm_to_vmem [thread:$0]  %s1702_s3, 512, %s48_s14, [#allocation7], %s1469_s29, %s1469_s29, %s1470_s30  }
  0x23   :  { %s1427_s0 = scalar_lea.vmem %s62_s16, 512  ;;  %p1432_p2 = scmp.lt.s32.totalorder %s62_s16, %s62_s16 }
  0x24   :  { %p1428_p1 = scmp.ne.s32.totalorder %s62_s16, %s1427_s0  ;;  %p1433_p3 = scmp.lt.s32.totalorder %s1427_s0, %s1427_s0 }
  0x26   :  { %p1434_p4 = por %p1433_p3, %p1432_p2 }
  0x28   :  { %p1435_p5 = pnand %p1434_p4, %p1428_p1 }
  0x2a   :  { %1438 = shalt.err (!%p1435_p5)
}
  0x2b   :  { %67 = dma.hbm_to_vmem [thread:$0]  %s1704_s5, 512, %s62_s16, [#allocation10], %s1469_s29, %s1469_s29, %s1470_s30  }
  0x2c   :  { %1459 = dma.done.wait [#allocation4], 256  }
  0x2d   :  { %1460 = vsyncadd [#allocation4], 4294967040 }
  0x2e   :  { %1461 = dma.done.wait [#allocation7], 1280  }
  0x2f   :  { %1462 = vsyncadd [#allocation7], 4294966016 }
  0x30   :  { %1463 = dma.done.wait [#allocation10], 512  }
  0x31   :  { %1464 = vsyncadd [#allocation10], 4294966784  ;;  %v1473_v0 = vmov 0.0   ;;  %vm1474_vm0 = vmmov 0   ;;  %v89_v1 = vld [vmem:[#allocation6 + $0x28] sm:$0xff]  ;;  %v88_v3 = vld [vmem:[#allocation6 + $0x20] sm:$0xff] }
  0x32   :  { %1201 = vmatprep.subr.mxu1 %v1473_v0  ;;  %1209 = vmatprep.mubr.msk.f32.mxu1 %vm1474_vm0, %v1473_v0  ;;  %v1545_v2 = vld [vmem:[#allocation8 + $0x18] sm:$0xff]  ;;  %v1548_v4 = vld [vmem:[#allocation8 + $0x10] sm:$0xff]  ;;  %v87_v5 = vld [vmem:[#allocation6 + $0x18] sm:$0xff]  ;;  %vm97_vm1 = vcmask 392192   ;;  %s1475_s21 = smov 64   ;;  %vm179_vm2 = vcmask 785408  }
  0x33   :  { %1186 = vmatprep.subr.mxu0 %v89_v1  ;;  %1202 = vmatpush3.msra.mxu1 %v1545_v2  ;;  %v1551_v6 = vld [vmem:[#allocation8 + $0x8] sm:$0xff]  ;;  %v86_v7 = vld [vmem:[#allocation6 + $0x10] sm:$0xff]  ;;  %v85_v9 = vld [vmem:[#allocation6 + $0x8] sm:$0xff]  ;;  %vm194_vm3 = vcmask 261120   ;;  %s1477_s25 = smov [#allocation11]  }
  0x34   :  { %1187 = vmatpush3.msra.mxu0 %v89_v1  ;;  %1203 = vmatprep.subr.mxu1 %v1473_v0  ;;  %v1555_v8 = vld [vmem:[#allocation8] sm:$0xff]  ;;  %v84_v11 = vld [vmem:[#allocation6] sm:$0xff]  ;;  %v83_v12 = vld [vmem:[#allocation3 + $0x8] sm:$0xff]  ;;  %s1101_s26 = sshll.u32 %s1477_s25, 4  ;;  %s1102_s26 = int_to_ptr.vmem [resolvable:$true] %s1101_s26 }
  0x35   :  { %1188 = vmatprep.subr.mxu0 %v88_v3  ;;  %1204 = vmatpush3.msra.mxu1 %v1548_v4  ;;  %v82_v10 = vld [vmem:[#allocation3] sm:$0xff]  ;;  %v1586_v13 = vld [vmem:[%s1703_s4] ss:$0 sm:$0xff]  ;;  %s1439_s27 = scalar_lea.vmem %s1102_s26, 32  ;;  %p1444_p7 = scmp.lt.s32.totalorder %s1102_s26, %s1102_s26 }
  0x36   :  { %1189 = vmatpush3.msra.mxu0 %v88_v3  ;;  %1205 = vmatprep.subr.mxu1 %v1473_v0  ;;  %v1112_v18 = vld [vmem:[%s1701_s2] ss:$0 sm:$0xff]  ;;  %s1476_s2 = smov 96   ;;  %p1440_p6 = scmp.ne.s32.totalorder %s1102_s26, %s1439_s27 }
  0x37   :  { %1190 = vmatprep.subr.mxu0 %v87_v5  ;;  %1206 = vmatpush3.msra.mxu1 %v1551_v6  ;;  %p1445_p8 = scmp.lt.s32.totalorder %s1439_s27, %s1439_s27 }
  0x38   :  { %1191 = vmatpush3.msra.mxu0 %v87_v5  ;;  %1207 = vmatprep.subr.mxu1 %v1473_v0 }
  0x39   :  { %1192 = vmatprep.subr.mxu0 %v86_v7  ;;  %1208 = vmatpush3.msra.mxu1 %v1555_v8  ;;  %p1446_p9 = por %p1445_p8, %p1444_p7 }
  0x3a   :  { %1193 = vmatpush3.msra.mxu0 %v86_v7  ;;  %1210 = vmatmul.mubr.f32.vlgmr.msra.gmra.mxu1 %v1473_v0 }
  0x3b   :  { %1194 = vmatprep.subr.mxu0 %v85_v9  ;;  %1198 = vmatprep.mubr.msk.f32.mxu0 %vm97_vm1, %v82_v10  ;;  %p1447_p10 = pnand %p1446_p9, %p1440_p6 }
  0x3c   :  { %1195 = vmatpush3.msra.mxu0 %v85_v9  ;;  %1212 = vmatprep.subr.mxu1 %v1473_v0 }
  0x3d   :  { %1196 = vmatprep.subr.mxu0 %v84_v11  ;;  %1213 = vmatpush3.msra.mxu1 %v1545_v2 }
  0x3e   :  { %1197 = vmatpush3.msra.mxu0 %v84_v11  ;;  %1214 = vmatprep.subr.mxu1 %v1473_v0 }
  0x3f   :  { %1199 = vmatmul.mubr.msk.f32.vlgmr.msra.gmra.mxu0 %vm97_vm1, %v83_v12  ;;  %1215 = vmatpush3.msra.mxu1 %v1548_v4 }
  0x40   :  { %1216 = vmatprep.subr.mxu1 %v1473_v0  ;;  %1220 = vmatprep.mubr.msk.f32.mxu1 %vm1474_vm0, %v1473_v0 }
  0x41   :  { %1217 = vmatpush3.msra.mxu1 %v1551_v6  ;;  %1223 = vmatprep.subr.mxu0 %v1473_v0 }
  0x42   :  { %1218 = vmatprep.subr.mxu1 %v1473_v0  ;;  %1224 = vmatpush3.msra.mxu0 %v1545_v2 }
  0x43   :  { %1219 = vmatpush3.msra.mxu1 %v1555_v8  ;;  %1225 = vmatprep.subr.mxu0 %v1473_v0 }
  0x44   :  { %1226 = vmatpush3.msra.mxu0 %v1548_v4  ;;  %1231 = vmatprep.mubr.msk.f32.mxu0 %vm1474_vm0, %v1473_v0 }
  0x45   :  { %1227 = vmatprep.subr.mxu0 %v1473_v0  ;;  %1234 = vmatprep.subr.mxu1 %v1473_v0 }
  0x46   :  { %1228 = vmatpush3.msra.mxu0 %v1551_v6 }
  0x47   :  { %1229 = vmatprep.subr.mxu0 %v1473_v0 }
  0x48   :  { %1230 = vmatpush3.msra.mxu0 %v1555_v8 }
  0x49   :  { %1245 = vmatprep.subr.mxu0 %v1473_v0 }
  0xfa   :  { %v264_v14 = vpop.f32.mrf.mxu1 }
  0xfb   :  { %v265_v15 = vadd.f32 %v1586_v13, %v264_v14 }
  0xfc   :  { %v1211_v16 = vpop.f32.mrf.mxu1 }
  0xfd   :  { %276 = vrot.lane.b32.xlu0 %v265_v15, %s1475_s21 }
  0xff   :  { %v1200_v17 = vpop.f32.mrf.mxu0 }
 0x100   :  { %v176_v19 = vadd.f32 %v1200_v17, %v1112_v18 }
 0x101   :  { %v170_v20 = vpop.f32.mrf.mxu0 }
 0x102   :  { %181 = vst.msk [vmem:[#allocation2 + $0x8] sm:$0xff] %vm179_vm2, %v176_v19  ;;  %v171_v21 = vadd.f32 %v1112_v18, %v170_v20 }
 0x104   :  { %180 = vst.msk [vmem:[#allocation2] sm:$0xff] %vm179_vm2, %v171_v21 }
 0x10b   :  { %v193_v22 = vld [vmem:[#allocation2] sm:$0x3]  ;;  %v294_v42 = vld [vmem:[#allocation2 + $0x2] sm:$0x3]  ;;  %v396_v62 = vld [vmem:[#allocation2 + $0x4] sm:$0x3] }
 0x10c   :  { %v268_v23 = vadd.f32 %v265_v15, %v193_v22 }
 0x10e   :  { %v1116_v24 = vmul.f32 -1.442695, %v268_v23 }
 0x110   :  { %1311 = vpow2.f32 %v1116_v24  ;;  %v498_v24 = vld [vmem:[#allocation2 + $0x6] sm:$0x3] }
 0x11d   :  { %v1312_v25 = vpop.eup %1311 }
 0x11e   :  { %v272_v26 = vadd.f32 1.0, %v1312_v25 }
 0x120   :  { %1313 = vrcp.f32 %v272_v26 }
 0x12d   :  { %v1314_v27 = vpop.eup %1313 }
 0x12e   :  { %v286_v33 = vsub.f32 1.0, %v1314_v27  ;;  %v292_v35 = vmul.f32 0.0, %v1314_v27 }
 0x16f   :  { %v277_v28 = vpop.permute.xlu0 %276 }
 0x170   :  { %v279_v29 = vmul.f32 %v1314_v27, %v277_v28 }
 0x172   :  { %281 = vrot.lane.b32.xlu0 %v279_v29, %s1475_s21 }
 0x1e4   :  { %v282_v30 = vpop.permute.xlu0 %281 }
 0x1e5   :  { %v284_v31 = vadd.f32 %v282_v30, %v193_v22 }
 0x1e7   :  { %1315 = vtanh.f32 %v284_v31 }
 0x1f4   :  { %v1316_v32 = vpop.eup %1315 }
 0x1f5   :  { %288 = vrot.lane.b32.xlu1 %v1316_v32, %s1476_s2 }
 0x267   :  { %v289_v34 = vpop.permute.xlu1 %288 }
 0x268   :  { %v291_v36 = vmul.f32 %v289_v34, %v286_v33 }
 0x26a   :  { %v293_v37 = vadd.f32 %v292_v35, %v291_v36 }
 0x26c   :  { %296 = vrot.lane.b32.xlu1 %v293_v37, %s1476_s2 }
 0x2de   :  { %v297_v38 = vpop.permute.xlu1 %296 }
 0x2df   :  { %1221 = vmatmul.mubr.msk.f32.vlgmr.msra.gmra.mxu1 %vm194_vm3, %v297_v38 }
 0x2e0   :  { %1235 = vmatpush3.msra.mxu1 %v1545_v2  ;;  %1242 = vmatprep.mubr.msk.f32.mxu1 %vm1474_vm0, %v1473_v0 }
 0x2e1   :  { %1236 = vmatprep.subr.mxu1 %v1473_v0 }
 0x2e2   :  { %1237 = vmatpush3.msra.mxu1 %v1548_v4 }
 0x2e3   :  { %1238 = vmatprep.subr.mxu1 %v1473_v0 }
 0x2e4   :  { %1239 = vmatpush3.msra.mxu1 %v1551_v6 }
 0x2e5   :  { %1240 = vmatprep.subr.mxu1 %v1473_v0 }
 0x2e6   :  { %1241 = vmatpush3.msra.mxu1 %v1555_v8 }
 0x2e7   :  { %1256 = vmatprep.subr.mxu1 %v1473_v0 }
 0x39f   :  { %v366_v39 = vpop.f32.mrf.mxu1 }
 0x3a0   :  { %v367_v40 = vadd.f32 %v1586_v13, %v366_v39 }
 0x3a1   :  { %v1222_v41 = vpop.f32.mrf.mxu1 }
 0x3a2   :  { %378 = vrot.lane.b32.xlu0 %v367_v40, %s1475_s21  ;;  %v370_v43 = vadd.f32 %v367_v40, %v294_v42 }
 0x3a4   :  { %v1118_v44 = vmul.f32 -1.442695, %v370_v43 }
 0x3a6   :  { %1317 = vpow2.f32 %v1118_v44  ;;  %v600_v44 = vld [vmem:[#allocation2 + $0x8] sm:$0x3] }
 0x3b3   :  { %v1318_v45 = vpop.eup %1317 }
 0x3b4   :  { %v374_v46 = vadd.f32 1.0, %v1318_v45 }
 0x3b6   :  { %1319 = vrcp.f32 %v374_v46 }
 0x3c3   :  { %v1320_v47 = vpop.eup %1319 }
 0x3c4   :  { %v388_v53 = vsub.f32 1.0, %v1320_v47  ;;  %v394_v55 = vmul.f32 %v1320_v47, %v293_v37 }
 0x414   :  { %v379_v48 = vpop.permute.xlu0 %378 }
 0x415   :  { %v381_v49 = vmul.f32 %v1320_v47, %v379_v48 }
 0x417   :  { %383 = vrot.lane.b32.xlu1 %v381_v49, %s1475_s21 }
 0x489   :  { %v384_v50 = vpop.permute.xlu1 %383 }
 0x48a   :  { %v386_v51 = vadd.f32 %v384_v50, %v294_v42 }
 0x48c   :  { %1321 = vtanh.f32 %v386_v51 }
 0x499   :  { %v1322_v52 = vpop.eup %1321 }
 0x49a   :  { %390 = vrot.lane.b32.xlu0 %v1322_v52, %s1476_s2 }
 0x50c   :  { %v391_v54 = vpop.permute.xlu0 %390 }
 0x50d   :  { %v393_v56 = vmul.f32 %v391_v54, %v388_v53 }
 0x50f   :  { %v395_v57 = vadd.f32 %v394_v55, %v393_v56 }
 0x511   :  { %398 = vrot.lane.b32.xlu1 %v395_v57, %s1476_s2 }
 0x583   :  { %v399_v58 = vpop.permute.xlu1 %398 }
 0x584   :  { %1232 = vmatmul.mubr.msk.f32.vlgmr.msra.gmra.mxu0 %vm194_vm3, %v399_v58 }
 0x585   :  { %1246 = vmatpush3.msra.mxu0 %v1545_v2  ;;  %1253 = vmatprep.mubr.msk.f32.mxu0 %vm1474_vm0, %v1473_v0 }
 0x586   :  { %1247 = vmatprep.subr.mxu0 %v1473_v0 }
 0x587   :  { %1248 = vmatpush3.msra.mxu0 %v1548_v4 }
 0x588   :  { %1249 = vmatprep.subr.mxu0 %v1473_v0 }
 0x589   :  { %1250 = vmatpush3.msra.mxu0 %v1551_v6 }
 0x58a   :  { %1251 = vmatprep.subr.mxu0 %v1473_v0 }
 0x58b   :  { %1252 = vmatpush3.msra.mxu0 %v1555_v8 }
 0x58c   :  { %1267 = vmatprep.subr.mxu0 %v1473_v0 }
 0x644   :  { %v468_v59 = vpop.f32.mrf.mxu0 }
 0x645   :  { %v469_v60 = vadd.f32 %v1586_v13, %v468_v59 }
 0x646   :  { %v1233_v61 = vpop.f32.mrf.mxu0 }
 0x647   :  { %480 = vrot.lane.b32.xlu0 %v469_v60, %s1475_s21  ;;  %v472_v63 = vadd.f32 %v469_v60, %v396_v62 }
 0x649   :  { %v1120_v1 = vmul.f32 -1.442695, %v472_v63 }
 0x64b   :  { %1323 = vpow2.f32 %v1120_v1 }
 0x658   :  { %v1324_v3 = vpop.eup %1323 }
 0x659   :  { %v476_v5 = vadd.f32 1.0, %v1324_v3 }
 0x65b   :  { %1325 = vrcp.f32 %v476_v5 }
 0x668   :  { %v1326_v7 = vpop.eup %1325 }
 0x669   :  { %v490_v15 = vsub.f32 1.0, %v1326_v7  ;;  %v496_v17 = vmul.f32 %v1326_v7, %v395_v57 }
 0x6b9   :  { %v481_v9 = vpop.permute.xlu0 %480 }
 0x6ba   :  { %v483_v10 = vmul.f32 %v1326_v7, %v481_v9 }
 0x6bc   :  { %485 = vrot.lane.b32.xlu1 %v483_v10, %s1475_s21 }
 0x72e   :  { %v486_v11 = vpop.permute.xlu1 %485 }
 0x72f   :  { %v488_v12 = vadd.f32 %v486_v11, %v396_v62 }
 0x731   :  { %1327 = vtanh.f32 %v488_v12 }
 0x73e   :  { %v1328_v14 = vpop.eup %1327 }
 0x73f   :  { %492 = vrot.lane.b32.xlu0 %v1328_v14, %s1476_s2 }
 0x7b1   :  { %v493_v16 = vpop.permute.xlu0 %492 }
 0x7b2   :  { %v495_v18 = vmul.f32 %v493_v16, %v490_v15 }
 0x7b4   :  { %v497_v19 = vadd.f32 %v496_v17, %v495_v18 }
 0x7b6   :  { %500 = vrot.lane.b32.xlu1 %v497_v19, %s1476_s2 }
 0x828   :  { %v501_v20 = vpop.permute.xlu1 %500 }
 0x829   :  { %1243 = vmatmul.mubr.msk.f32.vlgmr.msra.gmra.mxu1 %vm194_vm3, %v501_v20 }
 0x82a   :  { %1257 = vmatpush3.msra.mxu1 %v1545_v2  ;;  %1264 = vmatprep.mubr.msk.f32.mxu1 %vm1474_vm0, %v1473_v0 }
 0x82b   :  { %1258 = vmatprep.subr.mxu1 %v1473_v0 }
 0x82c   :  { %1259 = vmatpush3.msra.mxu1 %v1548_v4 }
 0x82d   :  { %1260 = vmatprep.subr.mxu1 %v1473_v0 }
 0x82e   :  { %1261 = vmatpush3.msra.mxu1 %v1551_v6 }
 0x82f   :  { %1262 = vmatprep.subr.mxu1 %v1473_v0 }
 0x830   :  { %1263 = vmatpush3.msra.mxu1 %v1555_v8 }
 0x831   :  { %1278 = vmatprep.subr.mxu1 %v1473_v0 }
 0x8e9   :  { %v570_v21 = vpop.f32.mrf.mxu1 }
 0x8ea   :  { %v571_v22 = vadd.f32 %v1586_v13, %v570_v21 }
 0x8eb   :  { %v1244_v23 = vpop.f32.mrf.mxu1 }
 0x8ec   :  { %582 = vrot.lane.b32.xlu0 %v571_v22, %s1475_s21  ;;  %v574_v25 = vadd.f32 %v571_v22, %v498_v24  ;;  %v804_v22 = vld [vmem:[#allocation2 + $0xc] sm:$0x3] }
 0x8ee   :  { %v1122_v26 = vmul.f32 -1.442695, %v574_v25 }
 0x8f0   :  { %1329 = vpow2.f32 %v1122_v26 }
 0x8fd   :  { %v1330_v27 = vpop.eup %1329 }
 0x8fe   :  { %v578_v28 = vadd.f32 1.0, %v1330_v27 }
 0x900   :  { %1331 = vrcp.f32 %v578_v28 }
 0x90d   :  { %v1332_v29 = vpop.eup %1331 }
 0x90e   :  { %v592_v35 = vsub.f32 1.0, %v1332_v29  ;;  %v598_v37 = vmul.f32 %v1332_v29, %v497_v19 }
 0x95e   :  { %v583_v30 = vpop.permute.xlu0 %582 }
 0x95f   :  { %v585_v31 = vmul.f32 %v1332_v29, %v583_v30 }
 0x961   :  { %587 = vrot.lane.b32.xlu1 %v585_v31, %s1475_s21 }
 0x9d3   :  { %v588_v32 = vpop.permute.xlu1 %587 }
 0x9d4   :  { %v590_v33 = vadd.f32 %v588_v32, %v498_v24 }
 0x9d6   :  { %1333 = vtanh.f32 %v590_v33 }
 0x9e3   :  { %v1334_v34 = vpop.eup %1333 }
 0x9e4   :  { %594 = vrot.lane.b32.xlu0 %v1334_v34, %s1476_s2 }
 0xa56   :  { %v595_v36 = vpop.permute.xlu0 %594 }
 0xa57   :  { %v597_v38 = vmul.f32 %v595_v36, %v592_v35 }
 0xa59   :  { %v599_v39 = vadd.f32 %v598_v37, %v597_v38 }
 0xa5b   :  { %602 = vrot.lane.b32.xlu1 %v599_v39, %s1476_s2 }
 0xacd   :  { %v603_v40 = vpop.permute.xlu1 %602 }
 0xace   :  { %1254 = vmatmul.mubr.msk.f32.vlgmr.msra.gmra.mxu0 %vm194_vm3, %v603_v40 }
 0xacf   :  { %1268 = vmatpush3.msra.mxu0 %v1545_v2  ;;  %1275 = vmatprep.mubr.msk.f32.mxu0 %vm1474_vm0, %v1473_v0 }
 0xad0   :  { %1269 = vmatprep.subr.mxu0 %v1473_v0 }
 0xad1   :  { %1270 = vmatpush3.msra.mxu0 %v1548_v4 }
 0xad2   :  { %1271 = vmatprep.subr.mxu0 %v1473_v0 }
 0xad3   :  { %1272 = vmatpush3.msra.mxu0 %v1551_v6 }
 0xad4   :  { %1273 = vmatprep.subr.mxu0 %v1473_v0 }
 0xad5   :  { %1274 = vmatpush3.msra.mxu0 %v1555_v8 }
 0xad6   :  { %1289 = vmatprep.subr.mxu0 %v1473_v0 }
 0xb8e   :  { %v672_v41 = vpop.f32.mrf.mxu0 }
 0xb8f   :  { %v673_v42 = vadd.f32 %v1586_v13, %v672_v41 }
 0xb90   :  { %v1255_v43 = vpop.f32.mrf.mxu0 }
 0xb91   :  { %684 = vrot.lane.b32.xlu0 %v673_v42, %s1475_s21  ;;  %v676_v45 = vadd.f32 %v673_v42, %v600_v44  ;;  %v906_v42 = vld [vmem:[#allocation2 + $0xe] sm:$0x3] }
 0xb93   :  { %v1124_v46 = vmul.f32 -1.442695, %v676_v45 }
 0xb95   :  { %1335 = vpow2.f32 %v1124_v46 }
 0xba2   :  { %v1336_v47 = vpop.eup %1335 }
 0xba3   :  { %v680_v48 = vadd.f32 1.0, %v1336_v47 }
 0xba5   :  { %1337 = vrcp.f32 %v680_v48 }
 0xbb2   :  { %v1338_v49 = vpop.eup %1337 }
 0xbb3   :  { %v694_v55 = vsub.f32 1.0, %v1338_v49  ;;  %v700_v57 = vmul.f32 %v1338_v49, %v599_v39 }
 0xc03   :  { %v685_v50 = vpop.permute.xlu0 %684 }
 0xc04   :  { %v687_v51 = vmul.f32 %v1338_v49, %v685_v50 }
 0xc06   :  { %689 = vrot.lane.b32.xlu1 %v687_v51, %s1475_s21 }
 0xc78   :  { %v690_v52 = vpop.permute.xlu1 %689 }
 0xc79   :  { %v692_v53 = vadd.f32 %v690_v52, %v600_v44  ;;  %v1011_v52 = vld [vmem:[#allocation9 + $0x18] sm:$0xff] }
 0xc7b   :  { %1339 = vtanh.f32 %v692_v53  ;;  %v1009_v53 = vld [vmem:[#allocation9 + $0x8] sm:$0xff] }
 0xc88   :  { %v1340_v54 = vpop.eup %1339 }
 0xc89   :  { %696 = vrot.lane.b32.xlu0 %v1340_v54, %s1476_s2  ;;  %v1008_v54 = vld [vmem:[#allocation9] sm:$0xff] }
 0xcfb   :  { %v697_v56 = vpop.permute.xlu0 %696 }
 0xcfc   :  { %v699_v58 = vmul.f32 %v697_v56, %v694_v55 }
 0xcfe   :  { %v701_v59 = vadd.f32 %v700_v57, %v699_v58 }
 0xd00   :  { %704 = vrot.lane.b32.xlu1 %v701_v59, %s1476_s2 }
 0xd72   :  { %v705_v60 = vpop.permute.xlu1 %704 }
 0xd73   :  { %1265 = vmatmul.mubr.msk.f32.vlgmr.msra.gmra.mxu1 %vm194_vm3, %v705_v60 }
 0xd74   :  { %1279 = vmatpush3.msra.mxu1 %v1545_v2  ;;  %1286 = vmatprep.mubr.msk.f32.mxu1 %vm1474_vm0, %v1473_v0  ;;  %v702_v2 = vld [vmem:[#allocation2 + $0xa] sm:$0x3] }
 0xd75   :  { %1280 = vmatprep.subr.mxu1 %v1473_v0 }
 0xd76   :  { %1281 = vmatpush3.msra.mxu1 %v1548_v4 }
 0xd77   :  { %1282 = vmatprep.subr.mxu1 %v1473_v0 }
 0xd78   :  { %1283 = vmatpush3.msra.mxu1 %v1551_v6 }
 0xd79   :  { %1284 = vmatprep.subr.mxu1 %v1473_v0 }
 0xd7a   :  { %1285 = vmatpush3.msra.mxu1 %v1555_v8 }
 0xe33   :  { %v774_v61 = vpop.f32.mrf.mxu1 }
 0xe34   :  { %v775_v62 = vadd.f32 %v1586_v13, %v774_v61 }
 0xe35   :  { %v1266_v63 = vpop.f32.mrf.mxu1 }
 0xe36   :  { %786 = vrot.lane.b32.xlu0 %v775_v62, %s1475_s21  ;;  %v778_v1 = vadd.f32 %v775_v62, %v702_v2  ;;  %v1131_v62 = vld [vmem:[%s1705_s6] ss:$0 sm:$0xff] }
 0xe38   :  { %v1126_v3 = vmul.f32 -1.442695, %v778_v1 }
 0xe3a   :  { %1341 = vpow2.f32 %v1126_v3 }
 0xe47   :  { %v1342_v5 = vpop.eup %1341 }
 0xe48   :  { %v782_v4 = vadd.f32 1.0, %v1342_v5 }
 0xe4a   :  { %1343 = vrcp.f32 %v782_v4 }
 0xe57   :  { %v1344_v7 = vpop.eup %1343 }
 0xe58   :  { %v796_v12 = vsub.f32 1.0, %v1344_v7  ;;  %v802_v15 = vmul.f32 %v1344_v7, %v701_v59 }
 0xea8   :  { %v787_v9 = vpop.permute.xlu0 %786 }
 0xea9   :  { %v789_v6 = vmul.f32 %v1344_v7, %v787_v9 }
 0xeab   :  { %791 = vrot.lane.b32.xlu1 %v789_v6, %s1475_s21 }
 0xf1d   :  { %v792_v10 = vpop.permute.xlu1 %791 }
 0xf1e   :  { %v794_v8 = vadd.f32 %v792_v10, %v702_v2 }
 0xf20   :  { %1345 = vtanh.f32 %v794_v8 }
 0xf2d   :  { %v1346_v11 = vpop.eup %1345 }
 0xf2e   :  { %798 = vrot.lane.b32.xlu0 %v1346_v11, %s1476_s2 }
 0xfa0   :  { %v799_v14 = vpop.permute.xlu0 %798 }
 0xfa1   :  { %v801_v16 = vmul.f32 %v799_v14, %v796_v12 }
 0xfa3   :  { %v803_v17 = vadd.f32 %v802_v15, %v801_v16 }
 0xfa5   :  { %806 = vrot.lane.b32.xlu1 %v803_v17, %s1476_s2 }
0x1017   :  { %v807_v18 = vpop.permute.xlu1 %806 }
0x1018   :  { %1276 = vmatmul.mubr.msk.f32.vlgmr.msra.gmra.mxu0 %vm194_vm3, %v807_v18 }
0x1019   :  { %1297 = vmatprep.mubr.msk.f32.mxu0 %vm1474_vm0, %v1473_v0  ;;  %1290 = vmatpush3.msra.mxu0 %v1011_v52 }
0x101a   :  { %1291 = vmatprep.subr.mxu0 %v1473_v0 }
0x10d8   :  { %v876_v19 = vpop.f32.mrf.mxu0 }
0x10d9   :  { %v877_v20 = vadd.f32 %v1586_v13, %v876_v19 }
0x10da   :  { %v1277_v21 = vpop.f32.mrf.mxu0 }
0x10db   :  { %888 = vrot.lane.b32.xlu0 %v877_v20, %s1475_s21  ;;  %v880_v23 = vadd.f32 %v877_v20, %v804_v22 }
0x10dd   :  { %v1128_v24 = vmul.f32 -1.442695, %v880_v23 }
0x10df   :  { %1347 = vpow2.f32 %v1128_v24 }
0x10ec   :  { %v1348_v25 = vpop.eup %1347 }
0x10ed   :  { %v884_v26 = vadd.f32 1.0, %v1348_v25 }
0x10ef   :  { %1349 = vrcp.f32 %v884_v26 }
0x10fc   :  { %v1350_v27 = vpop.eup %1349 }
0x10fd   :  { %v898_v33 = vsub.f32 1.0, %v1350_v27  ;;  %v904_v35 = vmul.f32 %v1350_v27, %v803_v17 }
0x114d   :  { %v889_v28 = vpop.permute.xlu0 %888 }
0x114e   :  { %v891_v29 = vmul.f32 %v1350_v27, %v889_v28 }
0x1150   :  { %893 = vrot.lane.b32.xlu1 %v891_v29, %s1475_s21 }
0x11c2   :  { %v894_v30 = vpop.permute.xlu1 %893 }
0x11c3   :  { %v896_v31 = vadd.f32 %v894_v30, %v804_v22 }
0x11c5   :  { %1351 = vtanh.f32 %v896_v31 }
0x11d2   :  { %v1352_v32 = vpop.eup %1351 }
0x11d3   :  { %900 = vrot.lane.b32.xlu0 %v1352_v32, %s1476_s2 }
0x1245   :  { %v901_v34 = vpop.permute.xlu0 %900 }
0x1246   :  { %v903_v36 = vmul.f32 %v901_v34, %v898_v33 }
0x1248   :  { %v905_v37 = vadd.f32 %v904_v35, %v903_v36 }
0x124a   :  { %908 = vrot.lane.b32.xlu1 %v905_v37, %s1476_s2 }
0x12bc   :  { %v909_v38 = vpop.permute.xlu1 %908 }
0x12bd   :  { %1287 = vmatmul.mubr.msk.f32.vlgmr.msra.gmra.mxu1 %vm194_vm3, %v909_v38 }
0x137d   :  { %v978_v39 = vpop.f32.mrf.mxu1 }
0x137e   :  { %v979_v40 = vadd.f32 %v1586_v13, %v978_v39  ;;  %v1010_v13 = vld [vmem:[#allocation9 + $0x10] sm:$0xff] }
0x137f   :  { %v1288_v41 = vpop.f32.mrf.mxu1  ;;  %1292 = vmatpush3.msra.mxu0 %v1010_v13 }
0x1380   :  { %990 = vrot.lane.b32.xlu0 %v979_v40, %s1475_s21  ;;  %v982_v43 = vadd.f32 %v979_v40, %v906_v42  ;;  %1293 = vmatprep.subr.mxu0 %v1473_v0 }
0x1381   :  { %1294 = vmatpush3.msra.mxu0 %v1009_v53 }
0x1382   :  { %v1130_v44 = vmul.f32 -1.442695, %v982_v43  ;;  %1295 = vmatprep.subr.mxu0 %v1473_v0 }
0x1383   :  { %1296 = vmatpush3.msra.mxu0 %v1008_v54 }
0x1384   :  { %1353 = vpow2.f32 %v1130_v44 }
0x1391   :  { %v1354_v45 = vpop.eup %1353 }
0x1392   :  { %v986_v46 = vadd.f32 1.0, %v1354_v45 }
0x1394   :  { %1355 = vrcp.f32 %v986_v46 }
0x13a1   :  { %v1356_v47 = vpop.eup %1355 }
0x13a2   :  { %v1000_v56 = vsub.f32 1.0, %v1356_v47  ;;  %v1006_v58 = vmul.f32 %v1356_v47, %v905_v37 }
0x13f2   :  { %v991_v48 = vpop.permute.xlu0 %990 }
0x13f3   :  { %v993_v49 = vmul.f32 %v1356_v47, %v991_v48 }
0x13f5   :  { %995 = vrot.lane.b32.xlu1 %v993_v49, %s1475_s21 }
0x1467   :  { %v996_v50 = vpop.permute.xlu1 %995 }
0x1468   :  { %v998_v51 = vadd.f32 %v996_v50, %v906_v42 }
0x146a   :  { %1357 = vtanh.f32 %v998_v51 }
0x1477   :  { %v1358_v55 = vpop.eup %1357 }
0x1478   :  { %1002 = vrot.lane.b32.xlu0 %v1358_v55, %s1476_s2 }
0x14ea   :  { %v1003_v57 = vpop.permute.xlu0 %1002 }
0x14eb   :  { %v1005_v59 = vmul.f32 %v1003_v57, %v1000_v56 }
0x14ed   :  { %v1007_v60 = vadd.f32 %v1006_v58, %v1005_v59 }
0x14ef   :  { %1020 = vrot.lane.b32.xlu1 %v1007_v60, %s1476_s2 }
0x1561   :  { %v1021_v61 = vpop.permute.xlu1 %1020 }
0x1562   :  { %1298 = vmatmul.mubr.msk.f32.vlgmr.msra.gmra.mxu0 %vm194_vm3, %v1021_v61 }
0x1622   :  { %v1090_v0 = vpop.f32.mrf.mxu0 }
0x1623   :  { %v1091_v63 = vadd.f32 %v1131_v62, %v1090_v0 }
0x1624   :  { %v1299_v2 = vpop.f32.mrf.mxu0 }
0x1625   :  { %1094 = vst [vmem:[#allocation11] sm:$0x3] %v1091_v63 }
0x1626   :  { %1450 = shalt.err (!%p1447_p10)
}
0x1627   :  { %1104 = dma.vmem_to_hbm [thread:$0]  %s1102_s26, 32, %s1706_s7, [#allocation5]  }
0x1628   :  { %1465 = dma.done.wait [#allocation5], 32  }
0x1629   :  { %1466 = vsyncadd [#allocation5], 4294967264 }
0x162a   :  { %1108 = vsyncpa [#allocation4], 1 }
0x162b   :  { %1109 = vsyncpa [#allocation7], 1 }
0x162c   :  { %1110 = vsyncpa [#allocation10], 1 }
0x162d   :  { %1111 = vsyncpa [#allocation5], 1 }

</bundles_post_ra>
